<compile_context>
chip_gen: v6e
topology: v6e:2x2x1
jax: 0.10.0
libtpu: 0.0.40
codegen_flags: <defaults>
</compile_context>

<pallas_src>
import functools

import jax
import jax.numpy as jnp
from jax.experimental import pallas as pl
from jax.experimental.pallas import tpu as pltpu


def _loss_kernel(o_ref, t_ref, w_ref, out_ref, *, loss_name):
    # Cast to f32 inside the kernel; HBM traffic stays at the native dtype.
    o = o_ref[...].astype(jnp.float32)
    t = t_ref[...].astype(jnp.float32)
    if loss_name == "TVLoss":
        elem = jnp.abs(o - t)                      # (tn, D), VPU only
    else:
        # (sqrt(o) - sqrt(t))**2 == o + t - 2*sqrt(o*t): one sqrt per element (EUP).
        elem = o + t - 2.0 * jnp.sqrt(o * t)       # (tn, D)
    row = jnp.sum(elem, axis=-1, keepdims=True)    # (tn, 1), XLU reduce
    out_ref[...] = w_ref[...].astype(jnp.float32) * row


def _pick_row_tile(n, d, itemsize, vmem_budget_bytes):
    """Largest row tile (multiple of 8) with 2 inputs x 2 bufs x tn*d*itemsize <= budget."""
    cap = (vmem_budget_bytes // (4 * d * itemsize)) // 8 * 8
    cap = max(8, cap)
    n_up8 = ((n + 7) // 8) * 8
    cap = min(cap, n_up8)
    if cap >= n_up8:
        return n_up8
    if n % cap == 0:
        return cap
    # Prefer a multiple-of-8 divisor of n (avoids a padding pass over HBM).
    for cand in range(cap, 7, -8):
        if n % cand == 0:
            return cand
    return cap  # no suitable divisor; caller pads rows with zeros


def custom_loss(output, target, weights, loss_name=None,
                *, vmem_budget_bytes=16 * 1024 * 1024):
    """Pallas equivalent of CustomLoss.forward. output/target: (N, D); weights: (N,)."""
    n, d = output.shape
    itemsize = jnp.dtype(output.dtype).itemsize
    tn = _pick_row_tile(n, d, itemsize, vmem_budget_bytes)

    n_pad = ((n + tn - 1) // tn) * tn
    if n_pad != n:
        # Zero rows contribute 0 to both the TV and HD terms (weights padded with 0).
        pad = n_pad - n
        output = jnp.pad(output, ((0, pad), (0, 0)))
        target = jnp.pad(target, ((0, pad), (0, 0)))
        weights = jnp.pad(weights, ((0, pad),))

    w2d = weights.reshape(n_pad, 1)

    per_row = pl.pallas_call(
        functools.partial(_loss_kernel, loss_name=loss_name),
        out_shape=jax.ShapeDtypeStruct((n_pad, 1), jnp.float32),
        grid_spec=pltpu.PrefetchScalarGridSpec(
            num_scalar_prefetch=0,
            grid=(n_pad // tn,),
            in_specs=[
                pl.BlockSpec((tn, d), lambda i: (i, 0)),
                pl.BlockSpec((tn, d), lambda i: (i, 0)),
                pl.BlockSpec((tn, 1), lambda i: (i, 0)),
            ],
            out_specs=pl.BlockSpec((tn, 1), lambda i: (i, 0)),
        ),
        compiler_params=pltpu.CompilerParams(
            dimension_semantics=("parallel",),
            vmem_limit_bytes=32 * 1024 * 1024,
        ),
    )(output, target, w2d)

    # TV: mean over N rows == sum / N ; HD: sum / output.shape[0] == sum / N.
    return 0.5 * jnp.sum(per_row) / n


def _reference(output, target, weights, loss_name=None):
    if loss_name == "TVLoss":
        return jnp.mean(0.5 * (weights * jnp.sum(jnp.abs(output - target), axis=-1)))
    return (
        0.5
        * (weights * jnp.sum((jnp.sqrt(output) - jnp.sqrt(target)) ** 2, axis=-1)).sum()
        / output.shape[0]
    )


if __name__ == "__main__":
    key = jax.random.PRNGKey(0)
    k1, k2, k3 = jax.random.split(key, 3)
    N, D = 16, 128

    # HD_Loss takes sqrt, so keep inputs positive (probability-like values).
    output = jax.random.uniform(k1, (N, D), jnp.float32, minval=0.01, maxval=1.0)
    target = jax.random.uniform(k2, (N, D), jnp.float32, minval=0.01, maxval=1.0)
    weights = jax.random.uniform(k3, (N,), jnp.float32, minval=0.0, maxval=1.0)

    tv = custom_loss(output, target, weights, loss_name="TVLoss")
    hd = custom_loss(output, target, weights, loss_name=None)
    jax.block_until_ready((tv, hd))

    tv_ref = _reference(output, target, weights, loss_name="TVLoss")
    hd_ref = _reference(output, target, weights, loss_name=None)

    assert jnp.allclose(tv, tv_ref, rtol=1e-5, atol=1e-5), (tv, tv_ref)
    assert jnp.allclose(hd, hd_ref, rtol=1e-5, atol=1e-5), (hd, hd_ref)
    print("KERNEL_OK")
</pallas_src>

<mosaic_0001>
module attributes {stable_mosaic.version = 11 : i64} {
  func.func @_loss_kernel(%arg0: i32, %arg1: memref<16x128xf32, #tpu.memory_space<vmem>>, %arg2: memref<16x128xf32, #tpu.memory_space<vmem>>, %arg3: memref<16x1xf32, #tpu.memory_space<vmem>>, %arg4: memref<16x1xf32, #tpu.memory_space<vmem>>) attributes {dimension_semantics = [#tpu.dimension_semantics<parallel>], iteration_bounds = array<i64: 1>, scalar_prefetch = 0 : i64, scratch_operands = 0 : i64, tpu.core_type = #tpu.core_type<tc>, window_params = [{transform_indices = @transform_0, window_bounds = array<i64: 16, 128>}, {transform_indices = @transform_1, window_bounds = array<i64: 16, 128>}, {transform_indices = @transform_2, window_bounds = array<i64: 16, 1>}, {transform_indices = @transform_3, window_bounds = array<i64: 16, 1>}]} {
    %c0 = arith.constant 0 : index
    %c0_0 = arith.constant 0 : index
    %0 = vector.load %arg1[%c0, %c0_0] : memref<16x128xf32, #tpu.memory_space<vmem>>, vector<16x128xf32>
    %c0_1 = arith.constant 0 : index
    %c0_2 = arith.constant 0 : index
    %1 = vector.load %arg2[%c0_1, %c0_2] : memref<16x128xf32, #tpu.memory_space<vmem>>, vector<16x128xf32>
    %2 = arith.subf %0, %1 : vector<16x128xf32>
    %3 = math.absf %2 : vector<16x128xf32>
    %cst = arith.constant dense<0.000000e+00> : vector<16xf32>
    %4 = vector.multi_reduction <add>, %3, %cst [1] : vector<16x128xf32> to vector<16xf32>
    %5 = vector.shape_cast %4 : vector<16xf32> to vector<16x1xf32>
    %c0_3 = arith.constant 0 : index
    %c0_4 = arith.constant 0 : index
    %6 = vector.load %arg3[%c0_3, %c0_4] : memref<16x1xf32, #tpu.memory_space<vmem>>, vector<16x1xf32>
    %7 = arith.mulf %6, %5 : vector<16x1xf32>
    %c0_5 = arith.constant 0 : index
    %c0_6 = arith.constant 0 : index
    %8 = vector.load %arg4[%c0_5, %c0_6] : memref<16x1xf32, #tpu.memory_space<vmem>>, vector<16x1xf32>
    tpu.vector_store %arg4[%c0_5, %c0_6], %7 {strides = array<i32>} : memref<16x1xf32, #tpu.memory_space<vmem>>, vector<16x1xf32>,
    return
  }
  func.func @transform_0(%arg0: i32) -> (i32, i32) {
    %c0_i32 = arith.constant 0 : i32
    %c0_i32_0 = arith.constant 0 : i32
    return %arg0, %c0_i32 : i32, i32
  }
  func.func @transform_1(%arg0: i32) -> (i32, i32) {
    %c0_i32 = arith.constant 0 : i32
    %c0_i32_0 = arith.constant 0 : i32
    return %arg0, %c0_i32 : i32, i32
  }
  func.func @transform_2(%arg0: i32) -> (i32, i32) {
    %c0_i32 = arith.constant 0 : i32
    %c0_i32_0 = arith.constant 0 : i32
    return %arg0, %c0_i32 : i32, i32
  }
  func.func @transform_3(%arg0: i32) -> (i32, i32) {
    %c0_i32 = arith.constant 0 : i32
    %c0_i32_0 = arith.constant 0 : i32
    return %arg0, %c0_i32 : i32, i32
  }
}

</mosaic_0001>

<bundles_post_ra>
// kernel: tpu_custom_call.1
= control target key start
LH: loop header
LB: loop body
LE: loop exit
PB: predicated region body
PF: predicated region fallthrough
CT: control target
= control target key end

     0   :  { %8 = vsyncpa [#allocation3], 0  ;;  %s77_s12 = smov [#allocation2]   ;;  %s121_s0 = inlined_call_operand.vmem [shape: f32[16,128], index: 0, kind: input, shape index: {}]   ;;  %s122_s1 = inlined_call_operand.hbm [shape: f32[16,128], index: 1, kind: input, shape index: {}]   ;;  %s123_s2 = inlined_call_operand.vmem [shape: f32[16,1], index: 2, kind: input, shape index: {}]   ;;  %s124_s3 = inlined_call_operand.vmem [shape: f32[16,1], index: 3, kind: output, shape index: {}]  }
   0x1   :  { %s16_s13 = sshll.u32 %s77_s12, 4  ;;  %s17_s13 = int_to_ptr.vmem [resolvable:$true] %s16_s13 }
   0x2   :  { %s63_s14 = scalar_lea.vmem %s17_s13, 256  ;;  %p68_p1 = scmp.lt.s32.totalorder %s17_s13, %s17_s13 }
   0x3   :  { %p64_p0 = scmp.ne.s32.totalorder %s17_s13, %s63_s14  ;;  %p69_p2 = scmp.lt.s32.totalorder %s63_s14, %s63_s14 }
   0x5   :  { %p70_p3 = por %p69_p2, %p68_p1 }
   0x7   :  { %p71_p4 = pnand %p70_p3, %p64_p0 }
   0x9   :  { %74 = shalt.err (!%p71_p4)
}
   0xa   :  { %s78_s15 = smov 128   ;;  %s79_s16 = smov 8  }
   0xb   :  { %22 = dma.hbm_to_vmem [thread:$0]  %s122_s1, 256, %s17_s13, [#allocation3], %s78_s15, %s78_s15, %s79_s16  }
   0xc   :  { %75 = dma.done.wait [#allocation3], 256  }
   0xd   :  { %76 = vsyncadd [#allocation3], 4294967040  ;;  %v28_v0 = vld [vmem:[%s121_s0] sm:$0xff]  ;;  %v29_v2 = vld [vmem:[%s121_s0 + $0x8] sm:$0xff]  ;;  %vm44_vm0 = vcmask 7168  }
   0xe   :  { %v30_v1 = vld [vmem:[#allocation2] sm:$0xff]  ;;  %v31_v4 = vld [vmem:[#allocation2 + $0x8] sm:$0xff] }
   0xf   :  { %v32_v3 = vsub.f32 %v28_v0, %v30_v1  ;;  %v33_v5 = vsub.f32 %v29_v2, %v31_v4  ;;  %v40_v8 = vld [vmem:[%s123_s2] sm:$0xff]  ;;  %v41_v11 = vld [vmem:[%s123_s2 + $0x8] sm:$0xff] }
  0x11   :  { %v34_v6 = vand.u32 2147483647, %v32_v3  ;;  %v35_v7 = vand.u32 2147483647, %v33_v5 }
  0x13   :  { %36 = vadd.xlane.f32.xlu0 %v34_v6 }
  0x17   :  { %38 = vadd.xlane.f32.xlu0 %v35_v7 }
  0x9c   :  { %v37_v9 = vpop.xlane.xlu0 %36 }
  0x9d   :  { %v42_v10 = vmul.f32 %v40_v8, %v37_v9 }
  0x9f   :  { %45 = vst.msk [vmem:[%s124_s3] sm:$0xff] %vm44_vm0, %v42_v10 }
  0xa0   :  { %v39_v12 = vpop.xlane.xlu0 %38 }
  0xa1   :  { %v43_v13 = vmul.f32 %v41_v11, %v39_v12 }
  0xa3   :  { %46 = vst.msk [vmem:[%s124_s3 + $0x8] sm:$0xff] %vm44_vm0, %v43_v13 }
  0xa4   :  { %51 = vsyncpa [#allocation3], 1 }

</bundles_post_ra>
